<compile_context>
chip_gen: v7x
topology: tpu7x:2x2x1
jax: 0.10.0
libtpu: 0.0.40
codegen_flags: <defaults>
</compile_context>

<pallas_src>
import functools

import jax
import jax.numpy as jnp
from jax.experimental import pallas as pl
from jax.experimental.pallas import tpu as pltpu


# --------------------------------------------------------------------------- #
# Kernel
# --------------------------------------------------------------------------- #
def _attention_mix_kernel(x_ref, y_ref, mt_ref, pall_ref, o_ref, *, num_heads):
    # x_ref   : (C, tk)        y_ref  : (C, tk, N)
    # mt_ref  : (C, H*C)  = stacked M_h^T (1/sqrt(C) folded in)
    # pall_ref: (C, H*C)  = stacked P_h
    # o_ref   : (C, tk)
    H = num_heads
    C = x_ref.shape[0]

    x = x_ref[...].astype(jnp.float32)                                  # (C, tk), tiny

    # One batched MXU dot for all heads' query projections, produced directly
    # in (k-on-sublanes) orientation so its per-channel columns lane-broadcast
    # against the (tk, N) y slabs with no relayout.
    qx_t = jnp.dot(x.T, mt_ref[...],
                   preferred_element_type=jnp.float32)                  # (tk, H*C)

    z_cols = []
    for h in range(H):                       # static unroll, H is tiny
        base = h * C

        # s[k, n] = sum_c (M_h x)[c, k] * y[c, k, n]
        # Accumulated channel-by-channel: never materializes a (C, tk, N)
        # buffer; y stays in its native dtype, each (tk, N) product is f32.
        s = qx_t[:, base:base + 1] * y_ref[0]
        for c in range(1, C):
            s = s + qx_t[:, base + c:base + c + 1] * y_ref[c]

        # softmax over N (lane axis), f32 throughout; exp + exact reciprocal
        # ride the EUP.  (approx=True caused the previous accuracy failure.)
        s = s - jnp.max(s, axis=-1, keepdims=True)
        e = jnp.exp(s)
        w = e * pl.reciprocal(jnp.sum(e, axis=-1, keepdims=True), approx=False)

        # z_t[k, h*C + c] = sum_n w[k, n] * y[c, k, n]   (lane reduce -> XLU)
        for c in range(C):
            z_cols.append(jnp.sum(w * y_ref[c], axis=-1, keepdims=True))  # (tk, 1)

    z_t = jnp.concatenate(z_cols, axis=-1)                               # (tk, H*C)

    # Folded output projection for all heads in one MXU dot (transposed-rhs
    # pattern); the result lands directly in the lane-dense (C, tk) layout.
    res = jnp.dot(pall_ref[...], z_t.T,
                  preferred_element_type=jnp.float32)                    # (C, tk)

    # TODO(synk): the optional `mask` branch of the PyTorch module
    # (masked_fill(-1e9) before softmax) is not implemented; mask=None only.
    o_ref[...] = (res + x).astype(o_ref.dtype)


# --------------------------------------------------------------------------- #
# VMEM planning
# --------------------------------------------------------------------------- #
def _vmem_capacity_bytes():
    """Physical VMEM of the current generation; conservative fallback."""
    try:
        return int(pltpu.get_tpu_info().vmem_capacity_bytes)
    except Exception:
        return 64 << 20        # v7x per-TensorCore physical VMEM (smallest gen)


def _tile_footprint_bytes(C, tk, N, y_itemsize, H, n_buf):
    """Bytes actually live in VMEM for one K tile.

    Counts the n_buf pipelined copies of the NATIVE-dtype y block plus the f32
    (tk, N) working slabs the kernel materializes (logits, exp, weights, one
    promoted product) and the small per-tile buffers.  y is never copied to
    f32 wholesale, so no whole-tile cast copy is budgeted.
    """
    f32 = 4
    y_block = C * tk * N * y_itemsize
    slabs = 4 * tk * N * f32
    small = (2 * H * C * tk + 4 * C * tk + 4 * H * C * C) * f32
    return n_buf * y_block + slabs + small


def _pick_k_tile(B, C, K, N, y_itemsize, H, budget_bytes):
    """Largest lane-dense K tile whose live VMEM footprint fits the budget."""
    # legal tiles: full K, or multiples of 128 dividing K (lane-dense x / out)
    candidates = [K] + [t for t in range(128, K, 128) if K % t == 0]

    def fits(t, n_buf=2):
        return _tile_footprint_bytes(C, t, N, y_itemsize, H, n_buf) <= budget_bytes

    fitting = [t for t in candidates if fits(t)]
    if fitting:
        tk = max(fitting)
    else:
        # TODO(synk): add an online-softmax N-tiling path (N grid axis marked
        # "arbitrary", running max/denominator scratch, pl.when finalize) so
        # very large total_pts neither forces a minimal K tile nor overflows
        # VMEM (tightest on v7x's 64 MiB).
        tk = min(candidates)

    # Keep both v7x TensorCores busy: if batch alone can't fill the "parallel"
    # axes, prefer >= 2 K steps over a single maximal tile.
    if B == 1 and K // tk < 2:
        smaller = [t for t in candidates if K // t >= 2]
        if smaller:
            smaller_fit = [t for t in smaller if fits(t)]
            tk = max(smaller_fit) if smaller_fit else min(smaller)

    # Triple-buffer the y stream when the grid is deep enough to benefit and
    # VMEM allows (hides the large strided y DMA, most useful on v5e).
    n_buf = 3 if (B * (K // tk) >= 3 and fits(tk, 3)) else 2
    return tk, n_buf


# --------------------------------------------------------------------------- #
# Wrapper
# --------------------------------------------------------------------------- #
def attention_mix(x, y, wq, wk, wv, wo, *, num_heads):
    B, C, K = x.shape
    N = y.shape[3]
    H = num_heads
    hp = jax.lax.Precision.HIGHEST

    # Fold the four 1x1 convs into two small f32 matrices, laid out so the
    # kernel's two batched MXU dots consume them directly:
    #   mt_all[a, h*C+c] = (Wk_h^T Wq_h)[c, a] / sqrt(C)
    #   p_all [o, h*C+c] = (Wo_h Wv_h)[o, c]
    # NOTE: pre-folding changes rounding slightly vs. the reference two-step
    # projections (~1e-6 relative with f32 weights).
    wq_h = wq.astype(jnp.float32).reshape(H, C, C)
    wk_h = wk.astype(jnp.float32).reshape(H, C, C)
    wv_h = wv.astype(jnp.float32).reshape(H, C, C)
    wo_h = wo.astype(jnp.float32).reshape(C, H, C).transpose(1, 0, 2)
    m = jnp.einsum('hca,hcb->hab', wk_h, wq_h, precision=hp) / (float(C) ** 0.5)
    p = jnp.einsum('hac,hcb->hab', wo_h, wv_h, precision=hp)
    mt_all = jnp.transpose(m, (2, 0, 1)).reshape(C, H * C)               # (C, H*C)
    p_all = jnp.transpose(p, (1, 0, 2)).reshape(C, H * C)                # (C, H*C)

    cap = _vmem_capacity_bytes()
    tk, n_buf = _pick_k_tile(B, C, K, N, jnp.dtype(y.dtype).itemsize, H,
                             budget_bytes=int(cap * 0.6))
    grid = (B, K // tk)

    y_spec_kwargs = {"pipeline_mode": pl.Buffered(n_buf)} if n_buf != 2 else {}

    kernel = functools.partial(_attention_mix_kernel, num_heads=H)

    return pl.pallas_call(
        kernel,
        out_shape=jax.ShapeDtypeStruct((B, C, K), x.dtype),
        grid_spec=pltpu.PrefetchScalarGridSpec(
            num_scalar_prefetch=0,
            grid=grid,
            in_specs=[
                pl.BlockSpec((pl.Squeezed(), C, tk), lambda b, kt: (b, 0, kt)),
                pl.BlockSpec((pl.Squeezed(), C, tk, N),
                             lambda b, kt: (b, 0, kt, 0), **y_spec_kwargs),
                pl.BlockSpec((C, H * C), lambda b, kt: (0, 0)),
                pl.BlockSpec((C, H * C), lambda b, kt: (0, 0)),
            ],
            out_specs=pl.BlockSpec((pl.Squeezed(), C, tk),
                                   lambda b, kt: (b, 0, kt)),
        ),
        compiler_params=pltpu.CompilerParams(
            dimension_semantics=("parallel", "parallel"),
            vmem_limit_bytes=int(cap * 0.8)),
    )(x, y, mt_all, p_all)


# --------------------------------------------------------------------------- #
# Pure-JAX reference (mask=None), highest matmul precision for a clean check
# --------------------------------------------------------------------------- #
def attention_mix_reference(x, y, wq, wk, wv, wo, *, num_heads):
    B, C, K = x.shape
    N = y.shape[3]
    hp = jax.lax.Precision.HIGHEST
    q = jnp.einsum('oc,bck->bok', wq, x, precision=hp).reshape(B, num_heads, C, K)
    kk = jnp.einsum('oc,bckn->bokn', wk, y, precision=hp).reshape(B, num_heads, C, K, N)
    vv = jnp.einsum('oc,bckn->bokn', wv, y, precision=hp).reshape(B, num_heads, C, K, N)
    w = jnp.einsum('bhck,bhckn->bhkn', q, kk, precision=hp) / (float(C) ** 0.5)
    w = jax.nn.softmax(w, axis=3)
    out = jnp.einsum('bhkn,bhckn->bhck', w, vv, precision=hp).reshape(B, num_heads * C, K)
    return jnp.einsum('oc,bck->bok', wo, out, precision=hp) + x


if __name__ == "__main__":
    B, C, H, K, N = 2, 4, 2, 8, 128   # batch, in_channels, num_heads, x_pts, total_pts
    CH = C * H

    key = jax.random.PRNGKey(0)
    kx, ky, kq, kk_, kv, ko = jax.random.split(key, 6)

    x = jax.random.normal(kx, (B, C, K), dtype=jnp.float32)
    y = jax.random.normal(ky, (B, C, K, N), dtype=jnp.float32)

    wq = jax.random.normal(kq, (CH, C), dtype=jnp.float32) * (1.0 / C ** 0.5)
    wk = jax.random.normal(kk_, (CH, C), dtype=jnp.float32) * (1.0 / C ** 0.5)
    wv = jax.random.normal(kv, (CH, C), dtype=jnp.float32) * (1.0 / C ** 0.5)
    wo = jax.random.normal(ko, (C, CH), dtype=jnp.float32) * (1.0 / CH ** 0.5)

    out = jax.block_until_ready(attention_mix(x, y, wq, wk, wv, wo, num_heads=H))
    ref = attention_mix_reference(x, y, wq, wk, wv, wo, num_heads=H)

    assert out.shape == (B, C, K)
    err = jnp.max(jnp.abs(out - ref))
    # Tolerance covers MXU f32 multi-pass rounding differences; exact
    # reciprocal keeps the kernel itself at ~1e-5 level error.
    assert jnp.allclose(out, ref, atol=3e-3, rtol=3e-3), f"max abs err {err}"

    print("KERNEL_OK")
</pallas_src>

<mosaic_0001>
module attributes {stable_mosaic.version = 11 : i64} {
  func.func @_attention_mix_kernel(%arg0: i32, %arg1: i32, %arg2: memref<1x4x8xf32, #tpu.memory_space<vmem>>, %arg3: memref<1x4x8x128xf32, #tpu.memory_space<vmem>>, %arg4: memref<4x8xf32, #tpu.memory_space<vmem>>, %arg5: memref<4x8xf32, #tpu.memory_space<vmem>>, %arg6: memref<1x4x8xf32, #tpu.memory_space<vmem>>) attributes {dimension_semantics = [#tpu.dimension_semantics<parallel>, #tpu.dimension_semantics<parallel>], iteration_bounds = array<i64: 2, 1>, scalar_prefetch = 0 : i64, scratch_operands = 0 : i64, tpu.core_type = #tpu.core_type<tc>, window_params = [{transform_indices = @transform_0, window_bounds = array<i64: 1, 4, 8>}, {transform_indices = @transform_1, window_bounds = array<i64: 1, 4, 8, 128>}, {pipeline_mode = #tpu.pipeline_mode<synchronous>, transform_indices = @transform_2, window_bounds = array<i64: 4, 8>}, {pipeline_mode = #tpu.pipeline_mode<synchronous>, transform_indices = @transform_3, window_bounds = array<i64: 4, 8>}, {transform_indices = @transform_4, window_bounds = array<i64: 1, 4, 8>}]} {
    %c0 = arith.constant 0 : index
    %c0_0 = arith.constant 0 : index
    %c0_1 = arith.constant 0 : index
    %0 = vector.load %arg2[%c0, %c0_0, %c0_1] : memref<1x4x8xf32, #tpu.memory_space<vmem>>, vector<1x4x8xf32>
    %1 = vector.shape_cast %0 : vector<1x4x8xf32> to vector<4x8xf32>
    %2 = tpu.transpose %1, [1, 0] : vector<4x8xf32> -> vector<8x4xf32>
    %c0_2 = arith.constant 0 : index
    %c0_3 = arith.constant 0 : index
    %3 = vector.load %arg4[%c0_2, %c0_3] : memref<4x8xf32, #tpu.memory_space<vmem>>, vector<4x8xf32>
    %cst = arith.constant dense<0.000000e+00> : vector<8x8xf32>
    %4 = tpu.matmul %2, %3, %cst {dimension_numbers = #tpu.dot_dimension_numbers<[1], [0], [0], [1], [0, 0, 1, 1], [], []>} : vector<8x4xf32>, vector<4x8xf32>, vector<8x8xf32> -> vector<8x8xf32>
    %5 = vector.extract_strided_slice %4 {offsets = [0, 0], sizes = [8, 1], strides = [1, 1]} : vector<8x8xf32> to vector<8x1xf32>
    %c0_4 = arith.constant 0 : index
    %c0_5 = arith.constant 0 : index
    %c0_6 = arith.constant 0 : index
    %c0_7 = arith.constant 0 : index
    %6 = vector.load %arg3[%c0_4, %c0_5, %c0_6, %c0_7] : memref<1x4x8x128xf32, #tpu.memory_space<vmem>>, vector<1x1x8x128xf32>
    %7 = vector.shape_cast %6 : vector<1x1x8x128xf32> to vector<8x128xf32>
    %8 = vector.broadcast %5 : vector<8x1xf32> to vector<8x128xf32>
    %9 = arith.mulf %8, %7 : vector<8x128xf32>
    %10 = vector.extract_strided_slice %4 {offsets = [0, 1], sizes = [8, 1], strides = [1, 1]} : vector<8x8xf32> to vector<8x1xf32>
    %c0_8 = arith.constant 0 : index
    %c1 = arith.constant 1 : index
    %c0_9 = arith.constant 0 : index
    %c0_10 = arith.constant 0 : index
    %11 = vector.load %arg3[%c0_8, %c1, %c0_9, %c0_10] : memref<1x4x8x128xf32, #tpu.memory_space<vmem>>, vector<1x1x8x128xf32>
    %12 = vector.shape_cast %11 : vector<1x1x8x128xf32> to vector<8x128xf32>
    %13 = vector.broadcast %10 : vector<8x1xf32> to vector<8x128xf32>
    %14 = arith.mulf %13, %12 : vector<8x128xf32>
    %15 = arith.addf %9, %14 : vector<8x128xf32>
    %16 = vector.extract_strided_slice %4 {offsets = [0, 2], sizes = [8, 1], strides = [1, 1]} : vector<8x8xf32> to vector<8x1xf32>
    %c0_11 = arith.constant 0 : index
    %c2 = arith.constant 2 : index
    %c0_12 = arith.constant 0 : index
    %c0_13 = arith.constant 0 : index
    %17 = vector.load %arg3[%c0_11, %c2, %c0_12, %c0_13] : memref<1x4x8x128xf32, #tpu.memory_space<vmem>>, vector<1x1x8x128xf32>
    %18 = vector.shape_cast %17 : vector<1x1x8x128xf32> to vector<8x128xf32>
    %19 = vector.broadcast %16 : vector<8x1xf32> to vector<8x128xf32>
    %20 = arith.mulf %19, %18 : vector<8x128xf32>
    %21 = arith.addf %15, %20 : vector<8x128xf32>
    %22 = vector.extract_strided_slice %4 {offsets = [0, 3], sizes = [8, 1], strides = [1, 1]} : vector<8x8xf32> to vector<8x1xf32>
    %c0_14 = arith.constant 0 : index
    %c3 = arith.constant 3 : index
    %c0_15 = arith.constant 0 : index
    %c0_16 = arith.constant 0 : index
    %23 = vector.load %arg3[%c0_14, %c3, %c0_15, %c0_16] : memref<1x4x8x128xf32, #tpu.memory_space<vmem>>, vector<1x1x8x128xf32>
    %24 = vector.shape_cast %23 : vector<1x1x8x128xf32> to vector<8x128xf32>
    %25 = vector.broadcast %22 : vector<8x1xf32> to vector<8x128xf32>
    %26 = arith.mulf %25, %24 : vector<8x128xf32>
    %27 = arith.addf %21, %26 : vector<8x128xf32>
    %cst_17 = arith.constant dense<0xFF800000> : vector<8xf32>
    %28 = vector.multi_reduction <maximumf>, %27, %cst_17 [1] : vector<8x128xf32> to vector<8xf32>
    %29 = vector.shape_cast %28 : vector<8xf32> to vector<8x1xf32>
    %30 = vector.broadcast %29 : vector<8x1xf32> to vector<8x128xf32>
    %31 = arith.subf %27, %30 : vector<8x128xf32>
    %32 = math.exp %31 : vector<8x128xf32>
    %cst_18 = arith.constant dense<0.000000e+00> : vector<8xf32>
    %33 = vector.multi_reduction <add>, %32, %cst_18 [1] : vector<8x128xf32> to vector<8xf32>
    %34 = vector.shape_cast %33 : vector<8xf32> to vector<8x1xf32>
    %35 = tpu.reciprocal %34 : vector<8x1xf32> -> vector<8x1xf32>
    %36 = vector.broadcast %35 : vector<8x1xf32> to vector<8x128xf32>
    %37 = arith.mulf %32, %36 : vector<8x128xf32>
    %c0_19 = arith.constant 0 : index
    %c0_20 = arith.constant 0 : index
    %c0_21 = arith.constant 0 : index
    %c0_22 = arith.constant 0 : index
    %38 = vector.load %arg3[%c0_19, %c0_20, %c0_21, %c0_22] : memref<1x4x8x128xf32, #tpu.memory_space<vmem>>, vector<1x1x8x128xf32>
    %39 = vector.shape_cast %38 : vector<1x1x8x128xf32> to vector<8x128xf32>
    %40 = arith.mulf %37, %39 : vector<8x128xf32>
    %cst_23 = arith.constant dense<0.000000e+00> : vector<8xf32>
    %41 = vector.multi_reduction <add>, %40, %cst_23 [1] : vector<8x128xf32> to vector<8xf32>
    %42 = vector.shape_cast %41 : vector<8xf32> to vector<8x1xf32>
    %c0_24 = arith.constant 0 : index
    %c1_25 = arith.constant 1 : index
    %c0_26 = arith.constant 0 : index
    %c0_27 = arith.constant 0 : index
    %43 = vector.load %arg3[%c0_24, %c1_25, %c0_26, %c0_27] : memref<1x4x8x128xf32, #tpu.memory_space<vmem>>, vector<1x1x8x128xf32>
    %44 = vector.shape_cast %43 : vector<1x1x8x128xf32> to vector<8x128xf32>
    %45 = arith.mulf %37, %44 : vector<8x128xf32>
    %cst_28 = arith.constant dense<0.000000e+00> : vector<8xf32>
    %46 = vector.multi_reduction <add>, %45, %cst_28 [1] : vector<8x128xf32> to vector<8xf32>
    %47 = vector.shape_cast %46 : vector<8xf32> to vector<8x1xf32>
    %c0_29 = arith.constant 0 : index
    %c2_30 = arith.constant 2 : index
    %c0_31 = arith.constant 0 : index
    %c0_32 = arith.constant 0 : index
    %48 = vector.load %arg3[%c0_29, %c2_30, %c0_31, %c0_32] : memref<1x4x8x128xf32, #tpu.memory_space<vmem>>, vector<1x1x8x128xf32>
    %49 = vector.shape_cast %48 : vector<1x1x8x128xf32> to vector<8x128xf32>
    %50 = arith.mulf %37, %49 : vector<8x128xf32>
    %cst_33 = arith.constant dense<0.000000e+00> : vector<8xf32>
    %51 = vector.multi_reduction <add>, %50, %cst_33 [1] : vector<8x128xf32> to vector<8xf32>
    %52 = vector.shape_cast %51 : vector<8xf32> to vector<8x1xf32>
    %c0_34 = arith.constant 0 : index
    %c3_35 = arith.constant 3 : index
    %c0_36 = arith.constant 0 : index
    %c0_37 = arith.constant 0 : index
    %53 = vector.load %arg3[%c0_34, %c3_35, %c0_36, %c0_37] : memref<1x4x8x128xf32, #tpu.memory_space<vmem>>, vector<1x1x8x128xf32>
    %54 = vector.shape_cast %53 : vector<1x1x8x128xf32> to vector<8x128xf32>
    %55 = arith.mulf %37, %54 : vector<8x128xf32>
    %cst_38 = arith.constant dense<0.000000e+00> : vector<8xf32>
    %56 = vector.multi_reduction <add>, %55, %cst_38 [1] : vector<8x128xf32> to vector<8xf32>
    %57 = vector.shape_cast %56 : vector<8xf32> to vector<8x1xf32>
    %58 = vector.extract_strided_slice %4 {offsets = [0, 4], sizes = [8, 1], strides = [1, 1]} : vector<8x8xf32> to vector<8x1xf32>
    %c0_39 = arith.constant 0 : index
    %c0_40 = arith.constant 0 : index
    %c0_41 = arith.constant 0 : index
    %c0_42 = arith.constant 0 : index
    %59 = vector.load %arg3[%c0_39, %c0_40, %c0_41, %c0_42] : memref<1x4x8x128xf32, #tpu.memory_space<vmem>>, vector<1x1x8x128xf32>
    %60 = vector.shape_cast %59 : vector<1x1x8x128xf32> to vector<8x128xf32>
    %61 = vector.broadcast %58 : vector<8x1xf32> to vector<8x128xf32>
    %62 = arith.mulf %61, %60 : vector<8x128xf32>
    %63 = vector.extract_strided_slice %4 {offsets = [0, 5], sizes = [8, 1], strides = [1, 1]} : vector<8x8xf32> to vector<8x1xf32>
    %c0_43 = arith.constant 0 : index
    %c1_44 = arith.constant 1 : index
    %c0_45 = arith.constant 0 : index
    %c0_46 = arith.constant 0 : index
    %64 = vector.load %arg3[%c0_43, %c1_44, %c0_45, %c0_46] : memref<1x4x8x128xf32, #tpu.memory_space<vmem>>, vector<1x1x8x128xf32>
    %65 = vector.shape_cast %64 : vector<1x1x8x128xf32> to vector<8x128xf32>
    %66 = vector.broadcast %63 : vector<8x1xf32> to vector<8x128xf32>
    %67 = arith.mulf %66, %65 : vector<8x128xf32>
    %68 = arith.addf %62, %67 : vector<8x128xf32>
    %69 = vector.extract_strided_slice %4 {offsets = [0, 6], sizes = [8, 1], strides = [1, 1]} : vector<8x8xf32> to vector<8x1xf32>
    %c0_47 = arith.constant 0 : index
    %c2_48 = arith.constant 2 : index
    %c0_49 = arith.constant 0 : index
    %c0_50 = arith.constant 0 : index
    %70 = vector.load %arg3[%c0_47, %c2_48, %c0_49, %c0_50] : memref<1x4x8x128xf32, #tpu.memory_space<vmem>>, vector<1x1x8x128xf32>
    %71 = vector.shape_cast %70 : vector<1x1x8x128xf32> to vector<8x128xf32>
    %72 = vector.broadcast %69 : vector<8x1xf32> to vector<8x128xf32>
    %73 = arith.mulf %72, %71 : vector<8x128xf32>
    %74 = arith.addf %68, %73 : vector<8x128xf32>
    %75 = vector.extract_strided_slice %4 {offsets = [0, 7], sizes = [8, 1], strides = [1, 1]} : vector<8x8xf32> to vector<8x1xf32>
    %c0_51 = arith.constant 0 : index
    %c3_52 = arith.constant 3 : index
    %c0_53 = arith.constant 0 : index
    %c0_54 = arith.constant 0 : index
    %76 = vector.load %arg3[%c0_51, %c3_52, %c0_53, %c0_54] : memref<1x4x8x128xf32, #tpu.memory_space<vmem>>, vector<1x1x8x128xf32>
    %77 = vector.shape_cast %76 : vector<1x1x8x128xf32> to vector<8x128xf32>
    %78 = vector.broadcast %75 : vector<8x1xf32> to vector<8x128xf32>
    %79 = arith.mulf %78, %77 : vector<8x128xf32>
    %80 = arith.addf %74, %79 : vector<8x128xf32>
    %cst_55 = arith.constant dense<0xFF800000> : vector<8xf32>
    %81 = vector.multi_reduction <maximumf>, %80, %cst_55 [1] : vector<8x128xf32> to vector<8xf32>
    %82 = vector.shape_cast %81 : vector<8xf32> to vector<8x1xf32>
    %83 = vector.broadcast %82 : vector<8x1xf32> to vector<8x128xf32>
    %84 = arith.subf %80, %83 : vector<8x128xf32>
    %85 = math.exp %84 : vector<8x128xf32>
    %cst_56 = arith.constant dense<0.000000e+00> : vector<8xf32>
    %86 = vector.multi_reduction <add>, %85, %cst_56 [1] : vector<8x128xf32> to vector<8xf32>
    %87 = vector.shape_cast %86 : vector<8xf32> to vector<8x1xf32>
    %88 = tpu.reciprocal %87 : vector<8x1xf32> -> vector<8x1xf32>
    %89 = vector.broadcast %88 : vector<8x1xf32> to vector<8x128xf32>
    %90 = arith.mulf %85, %89 : vector<8x128xf32>
    %c0_57 = arith.constant 0 : index
    %c0_58 = arith.constant 0 : index
    %c0_59 = arith.constant 0 : index
    %c0_60 = arith.constant 0 : index
    %91 = vector.load %arg3[%c0_57, %c0_58, %c0_59, %c0_60] : memref<1x4x8x128xf32, #tpu.memory_space<vmem>>, vector<1x1x8x128xf32>
    %92 = vector.shape_cast %91 : vector<1x1x8x128xf32> to vector<8x128xf32>
    %93 = arith.mulf %90, %92 : vector<8x128xf32>
    %cst_61 = arith.constant dense<0.000000e+00> : vector<8xf32>
    %94 = vector.multi_reduction <add>, %93, %cst_61 [1] : vector<8x128xf32> to vector<8xf32>
    %95 = vector.shape_cast %94 : vector<8xf32> to vector<8x1xf32>
    %c0_62 = arith.constant 0 : index
    %c1_63 = arith.constant 1 : index
    %c0_64 = arith.constant 0 : index
    %c0_65 = arith.constant 0 : index
    %96 = vector.load %arg3[%c0_62, %c1_63, %c0_64, %c0_65] : memref<1x4x8x128xf32, #tpu.memory_space<vmem>>, vector<1x1x8x128xf32>
    %97 = vector.shape_cast %96 : vector<1x1x8x128xf32> to vector<8x128xf32>
    %98 = arith.mulf %90, %97 : vector<8x128xf32>
    %cst_66 = arith.constant dense<0.000000e+00> : vector<8xf32>
    %99 = vector.multi_reduction <add>, %98, %cst_66 [1] : vector<8x128xf32> to vector<8xf32>
    %100 = vector.shape_cast %99 : vector<8xf32> to vector<8x1xf32>
    %c0_67 = arith.constant 0 : index
    %c2_68 = arith.constant 2 : index
    %c0_69 = arith.constant 0 : index
    %c0_70 = arith.constant 0 : index
    %101 = vector.load %arg3[%c0_67, %c2_68, %c0_69, %c0_70] : memref<1x4x8x128xf32, #tpu.memory_space<vmem>>, vector<1x1x8x128xf32>
    %102 = vector.shape_cast %101 : vector<1x1x8x128xf32> to vector<8x128xf32>
    %103 = arith.mulf %90, %102 : vector<8x128xf32>
    %cst_71 = arith.constant dense<0.000000e+00> : vector<8xf32>
    %104 = vector.multi_reduction <add>, %103, %cst_71 [1] : vector<8x128xf32> to vector<8xf32>
    %105 = vector.shape_cast %104 : vector<8xf32> to vector<8x1xf32>
    %c0_72 = arith.constant 0 : index
    %c3_73 = arith.constant 3 : index
    %c0_74 = arith.constant 0 : index
    %c0_75 = arith.constant 0 : index
    %106 = vector.load %arg3[%c0_72, %c3_73, %c0_74, %c0_75] : memref<1x4x8x128xf32, #tpu.memory_space<vmem>>, vector<1x1x8x128xf32>
    %107 = vector.shape_cast %106 : vector<1x1x8x128xf32> to vector<8x128xf32>
    %108 = arith.mulf %90, %107 : vector<8x128xf32>
    %cst_76 = arith.constant dense<0.000000e+00> : vector<8xf32>
    %109 = vector.multi_reduction <add>, %108, %cst_76 [1] : vector<8x128xf32> to vector<8xf32>
    %110 = vector.shape_cast %109 : vector<8xf32> to vector<8x1xf32>
    %111 = tpu.concatenate %42, %47, %52, %57, %95, %100, %105, %110 in 1 : vector<8x1xf32>, vector<8x1xf32>, vector<8x1xf32>, vector<8x1xf32>, vector<8x1xf32>, vector<8x1xf32>, vector<8x1xf32>, vector<8x1xf32> -> vector<8x8xf32>
    %c0_77 = arith.constant 0 : index
    %c0_78 = arith.constant 0 : index
    %112 = vector.load %arg5[%c0_77, %c0_78] : memref<4x8xf32, #tpu.memory_space<vmem>>, vector<4x8xf32>
    %113 = tpu.transpose %111, [1, 0] : vector<8x8xf32> -> vector<8x8xf32>
    %cst_79 = arith.constant dense<0.000000e+00> : vector<4x8xf32>
    %114 = tpu.matmul %112, %113, %cst_79 {dimension_numbers = #tpu.dot_dimension_numbers<[1], [0], [0], [1], [0, 0, 1, 1], [], []>} : vector<4x8xf32>, vector<8x8xf32>, vector<4x8xf32> -> vector<4x8xf32>
    %115 = arith.addf %114, %1 : vector<4x8xf32>
    %c0_80 = arith.constant 0 : index
    %c0_81 = arith.constant 0 : index
    %c0_82 = arith.constant 0 : index
    %116 = vector.load %arg6[%c0_80, %c0_81, %c0_82] : memref<1x4x8xf32, #tpu.memory_space<vmem>>, vector<1x4x8xf32>
    %117 = vector.shape_cast %116 : vector<1x4x8xf32> to vector<4x8xf32>
    %118 = vector.shape_cast %115 : vector<4x8xf32> to vector<1x4x8xf32>
    tpu.vector_store %arg6[%c0_80, %c0_81, %c0_82], %118 {strides = array<i32>} : memref<1x4x8xf32, #tpu.memory_space<vmem>>, vector<1x4x8xf32>,
    return
  }
  func.func @transform_0(%arg0: i32, %arg1: i32) -> (i32, i32, i32) {
    %c0_i32 = arith.constant 0 : i32
    %c0_i32_0 = arith.constant 0 : i32
    return %arg0, %c0_i32, %arg1 : i32, i32, i32
  }
  func.func @transform_1(%arg0: i32, %arg1: i32) -> (i32, i32, i32, i32) {
    %c0_i32 = arith.constant 0 : i32
    %c0_i32_0 = arith.constant 0 : i32
    %c0_i32_1 = arith.constant 0 : i32
    return %arg0, %c0_i32, %arg1, %c0_i32_0 : i32, i32, i32, i32
  }
  func.func @transform_2(%arg0: i32, %arg1: i32) -> (i32, i32) {
    %c0_i32 = arith.constant 0 : i32
    %c0_i32_0 = arith.constant 0 : i32
    %c0_i32_1 = arith.constant 0 : i32
    return %c0_i32, %c0_i32_0 : i32, i32
  }
  func.func @transform_3(%arg0: i32, %arg1: i32) -> (i32, i32) {
    %c0_i32 = arith.constant 0 : i32
    %c0_i32_0 = arith.constant 0 : i32
    %c0_i32_1 = arith.constant 0 : i32
    return %c0_i32, %c0_i32_0 : i32, i32
  }
  func.func @transform_4(%arg0: i32, %arg1: i32) -> (i32, i32, i32) {
    %c0_i32 = arith.constant 0 : i32
    %c0_i32_0 = arith.constant 0 : i32
    return %arg0, %c0_i32, %arg1 : i32, i32, i32
  }
}

</mosaic_0001>

<bundles_post_ra>
// kernel: tpu_custom_call.1
= control target key start
LH: loop header
LB: loop body
LE: loop exit
PB: predicated region body
PF: predicated region fallthrough
CT: control target
= control target key end

     0   :  { %9 = vsyncpa [#allocation3], 0  ;;  %s1262_s0 = inlined_call_operand.hbm [shape: f32[2,4,8], index: 0, kind: input, shape index: {}]   ;;  %s1263_s1 = inlined_call_operand.hbm [shape: f32[2,4,8,128], index: 1, kind: input, shape index: {}]   ;;  %s1264_s2 = inlined_call_operand.vmem [shape: f32[4,8], index: 2, kind: input, shape index: {}]   ;;  %s1265_s3 = inlined_call_operand.vmem [shape: f32[4,8], index: 3, kind: input, shape index: {}]   ;;  %s1266_s4 = inlined_call_operand.hbm [shape: f32[2,4,8], index: 4, kind: output, shape index: {}]  }
   0x1   :  { %11 = vsyncpa [#allocation3 + $0x1], 0 }
   0x2   :  { %12 = vsyncpa [#allocation6], 0 }
   0x3   :  { %14 = vsyncpa [#allocation6 + $0x1], 0 }
   0x4   :  { %15 = vsyncpa [#allocation4], 0 }
   0x5   :  { %17 = vsyncpa [#allocation4 + $0x1], 0  ;;  %s1017_s15 = smov 0   ;;  %s1019_s16 = smov 0  }
   0x6   :  { %s1021_s17 = smov 0   ;;  %s1023_s18 = smov 0  }
   0x7   :  { %s1025_s19 = smov 0   ;;  %s1027_s20 = smov 0  }
   0x8 LB: > { %s694_s21 = sadd.s32 4294967295, %s975_s20   ;;  %s695_s22 = sadd.s32 4294967294, %s975_s20   ;;  %s975_s20 = sphi %s1027_s20, %s23_s20   ;;  %s971_s19 = sphi %s1025_s19, %s1285_s19   ;;  %s967_s18 = sphi %s1023_s18, %s1284_s18   ;;  %s963_s17 = sphi %s1021_s17, %s1283_s17   ;;  %s959_s16 = sphi %s1019_s16, %s1282_s16   ;;  %s955_s15 = sphi %s1017_s15, %s1281_s15  }
   0x9   : > { %s35_s23 = sadd.s32 1, %s971_s19  ;;  %s44_s24 = sadd.s32 1, %s963_s17 }
   0xa   : > { %p37_p0 = scmp.ge.s32.totalorder %s35_s23, 2  ;;  %p51_p1 = scmp.ne.s32.totalorder %s963_s17, %s959_s16 }
   0xb   : > { %p52_p2 = scmp.eq.s32.totalorder %s975_s20, 0  ;;  %p57_p3 = scmp.ne.s32.totalorder %s959_s16, %s955_s15 }
   0xc   : > { %s1287_s23 = smov (%p37_p0, %s35_s23), 0  ;;  %p58_p5 = scmp.eq.s32.totalorder %s694_s21, 0 }
   0xd   : > { %p1058_p4 = por %p52_p2, %p51_p1  ;;  %s39_s26 = ssub.s32 %s971_s19, %s1287_s23 }
   0xe   : > { %p153_p6 = scmp.eq.s32.totalorder %s694_s21, 1  ;;  %p42_p7 = scmp.eq.s32.totalorder %s39_s26, 0 }
   0xf   : > { %p1064_p8 = por %p58_p5, %p57_p3  ;;  %p159_p10 = scmp.eq.s32.totalorder %s695_s22, 1 }
  0x10   : > { %p1068_p9 = por %p153_p6, %p51_p1  ;;  %p750_p13 = scmp.lt.s32.totalorder %s975_s20, 2 }
  0x11   : > { %s1270_s27 = scalar_select %p1064_p8, 1, 0 }
  0x12   : > { %s1271_s28 = scalar_select %p1068_p9, 1, 0 }
  0x13   : > { %s1073_s29 = scalar_select %p42_p7, %s963_s17, %s44_s24  }
  0x14   : > { %p1075_p11 = por %p159_p10, %p57_p3  ;;  %s1082_s5 = sand.u32 1, %s963_s17  }
  0x15   : > { %s698_s6 = sshll.u32 %s1082_s5, 2  ;;  %s699_s7 = sshll.u32 %s971_s19, 6 }
  0x16   : > { %s1272_s30 = scalar_select %p1075_p11, 1, 0 }
  0x17   : > { %s1089_s10 = scalar_lea.hbm %s1262_s0, %s699_s7  ;;  %s189_s11 = scalar_lea.vmem [#allocation2], %s698_s6 }
  0x18   : > { %s197_s12 = sshll.u32 %s189_s11, 4  ;;  %p1095_p0 = pnand %p750_p13, %p1058_p4  ;;  %s1091_s12 = int_to_ptr.vmem [resolvable:$true] %s197_s12 }
  0x19   : > { %s186_s14 = scalar_lea.sflag [#allocation3], %s1082_s5  ;;  %s829_s21 = scalar_lea.hbm %s1089_s10, 64 }
  0x1a   : > { %p830_p3 = scmp.ne.s32.totalorder %s1089_s10, %s829_s21  ;;  %p831_p5 = pneg %p1095_p0 }
  0x1b   : > { %s834_s25 = scalar_lea.hbm %s1262_s0, 128  ;;  %p835_p4 = scmp.lt.u32.totalorder %s1089_s10, %s1262_s0 }
  0x1c   : > { %p832_p6 = pnand %p831_p5, %p830_p3  ;;  %p836_p10 = scmp.lt.u32.totalorder %s834_s25, %s829_s21 }
  0x1d   : > { %p838_p12 = scmp.lt.u32.totalorder %s829_s21, %s1089_s10 }
  0x1e   : > { %p833_p7 = pneg %p832_p6  ;;  %p837_p13 = por %p836_p10, %p835_p4 }
  0x20   : > { %p839_p1 = por %p838_p12, %p837_p13 }
  0x22   : > { %p840_p2 = pnand %p839_p1, %p833_p7 }
  0x24   : > { %843 = shalt.err (!%p840_p2)
}
  0x25   : > { %s844_s7 = scalar_lea.vmem %s1091_s12, 64  ;;  %s977_s8 = smov [#allocation2]  }
  0x26   : > { %p845_p3 = scmp.ne.s32.totalorder %s1091_s12, %s844_s7  ;;  %s849_s9 = sshll.u32 %s977_s8, 4  ;;  %s850_s9 = int_to_ptr.vmem [resolvable:$false] %s849_s9 }
  0x27   : > { %s851_s11 = scalar_lea.vmem %s850_s9, 128  ;;  %p852_p9 = scmp.lt.s32.totalorder %s1091_s12, %s850_s9 }
  0x28   : > { %p847_p6 = pnand %p845_p3, %p831_p5  ;;  %p853_p4 = scmp.lt.s32.totalorder %s851_s11, %s844_s7 }
  0x2a   : > { %p848_p11 = pneg %p847_p6  ;;  %p854_p10 = por %p853_p4, %p852_p9 }
  0x2c   : > { %p855_p12 = pnand %p854_p10, %p848_p11 }
  0x2e   : > { %858 = shalt.err (!%p855_p12)
}
  0x2f   : > { %742 = dma.hbm_to_vmem [thread:$0]  (!%p1095_p0), %s1089_s10, 64, %s1091_s12, %s186_s14  }
  0x30   : > { %p1274_p1 = scmp.lt.s32.totalorder %s975_s20, 3  ;;  %p1275_p2 = scmp.ge.s32.totalorder %s975_s20, 1 }
  0x31   : > { %s700_s22 = sshll.u32 %s1082_s5, 5  ;;  %s718_s24 = sshll.u32 %s971_s19, 9 }
  0x32   : > { %p1131_p7 = pnand %p1275_p2, %p1274_p1  ;;  %s1140_s6 = scalar_lea.hbm %s1263_s1, %s718_s24 }
  0x33   : > { %s208_s7 = scalar_lea.vmem [#allocation5], %s700_s22  ;;  %s205_s10 = scalar_lea.sflag [#allocation6], %s1082_s5 }
  0x34   : > { %s216_s8 = sshll.u32 %s208_s7, 4  ;;  %s859_s12 = scalar_lea.hbm %s1140_s6, 512  ;;  %s1142_s8 = int_to_ptr.vmem [resolvable:$true] %s216_s8 }
  0x35   : > { %p860_p9 = scmp.ne.s32.totalorder %s1140_s6, %s859_s12  ;;  %s864_s11 = scalar_lea.hbm %s1263_s1, 1024 }
  0x36   : > { %p865_p3 = scmp.lt.u32.totalorder %s1140_s6, %s1263_s1  ;;  %p866_p6 = scmp.lt.u32.totalorder %s864_s11, %s859_s12 }
  0x37   : > { %p862_p11 = pnand %p860_p9, %p831_p5  ;;  %p868_p10 = scmp.lt.u32.totalorder %s859_s12, %s1140_s6 }
  0x38   : > { %p867_p4 = por %p866_p6, %p865_p3 }
  0x39   : > { %p863_p13 = pneg %p862_p11 }
  0x3a   : > { %p869_p12 = por %p868_p10, %p867_p4 }
  0x3c   : > { %p870_p1 = pnand %p869_p12, %p863_p13 }
  0x3e   : > { %873 = shalt.err (!%p870_p1)
}
  0x3f   : > { %s874_s22 = scalar_lea.vmem %s1142_s8, 512  ;;  %s978_s26 = smov [#allocation5]  }
  0x40   : > { %p875_p2 = scmp.ne.s32.totalorder %s1142_s8, %s874_s22  ;;  %s879_s7 = sshll.u32 %s978_s26, 4  ;;  %s880_s7 = int_to_ptr.vmem [resolvable:$false] %s879_s7 }
  0x41   : > { %s881_s14 = scalar_lea.vmem %s880_s7, 1024  ;;  %p882_p8 = scmp.lt.s32.totalorder %s1142_s8, %s880_s7 }
  0x42   : > { %p877_p9 = pnand %p875_p2, %p831_p5  ;;  %p883_p3 = scmp.lt.s32.totalorder %s881_s14, %s874_s22 }
  0x44   : > { %p878_p11 = pneg %p877_p9  ;;  %p884_p6 = por %p883_p3, %p882_p8 }
  0x46   : > { %p885_p4 = pnand %p884_p6, %p878_p11 }
  0x48   : > { %888 = shalt.err (!%p885_p4)
}
  0x49   : > { %s979_s12 = smov 128   ;;  %s980_s9 = smov 8  }
  0x4a   : > { %745 = dma.hbm_to_vmem [thread:$0]  (!%p1095_p0), %s1140_s6, 512, %s1142_s8, %s205_s10, %s979_s12, %s979_s12, %s980_s9  }
  0x4b   : > { %228 = sbr.rel (%p1131_p7) target bundleno = 1285 (0x505), region = 36  ;;  %s1173_s11 = sand.u32 (!%p1131_p7), 1, %s959_s16  }
  0x4c   : > { %s704_s24 = sshll.u32 (!%p1131_p7), %s1173_s11, 2  ;;  %s231_s25 = scalar_lea.sflag (!%p1131_p7), [#allocation3], %s1173_s11 }
  0x4d   : > { %s234_s22 = scalar_lea.vmem (!%p1131_p7), [#allocation2], %s704_s24  ;;  %p1277_p8 = scmp.ne.s32.totalorder (!%p1131_p7), %s1270_s27, 0 }
  0x52   : > { %942 = dma.done.wait (%p1277_p8), %s231_s25, 64  }
  0x53   : > { %944 = vsyncadd (%p1277_p8), %s231_s25, 4294967232  ;;  %s705_s5 = sshll.u32 %s1173_s11, 5  ;;  %s240_s13 = scalar_lea.sflag [#allocation6], %s1173_s11 }
  0x54   : > { %s1185_s21 = scalar_lea.vmem [#allocation5], %s705_s5 }
  0x55   : > { %946 = dma.done.wait (%p1277_p8), %s240_s13, 512  }
  0x56   : > { %948 = vsyncadd (%p1277_p8), %s240_s13, 4294966784  ;;  %v981_v0 = vmov 0.0   ;;  %vm982_vm0 = vmmov 0   ;;  %vm311_vm1 = vcmask 1043456   ;;  %v1191_v1 = vld [vmem:[%s234_s22] sm:$0xf] }
  0x57   : > { %723 = vmatprep.subr.mxu0 %v981_v0  ;;  %725 = vmatprep.mubr.msk.f32.mxu0 %vm982_vm0, %v981_v0  ;;  %v306_v2 = vld [vmem:[%s1264_s2] sm:$0xf]  ;;  %v983_v3 = vmov 1   ;;  %v984_v4 = vmov 0   ;;  %vm307_vm2 = vcmask 31744   ;;  %v985_v8 = vmov 2  }
  0x58   : > { %728 = vmatprep.subr.mxu1 %v981_v0  ;;  %730 = vmatprep.mubr.msk.f32.mxu1 %vm982_vm0, %v981_v0  ;;  %v986_v9 = vmov 7   ;;  %v987_v10 = vmov 4   ;;  %v988_v11 = vmov 5   ;;  %v989_v12 = vmov 3   ;;  %v709_v17 = vld [vmem:[%s1185_s21 + $0x8] sm:$0xff]  ;;  %v385_v18 = vld [vmem:[%s1185_s21] sm:$0xff] }
  0x59   : > { %274 = vxpose.xlu0.b32.start.end [1/1] (short) (narrow) %v1191_v1, 8  ;;  %724 = vmatpush3.msk.msra.mxu0 %vm311_vm1, %v306_v2  ;;  %v990_v13 = vmov 6   ;;  %v710_v20 = vld [vmem:[%s1185_s21 + $0x10] sm:$0xff]  ;;  %v711_v25 = vld [vmem:[%s1185_s21 + $0x18] sm:$0xff]  ;;  %vm481_vm3 = vcmask 7168   ;;  %vm483_vm4 = vcmask 15360  }
  0x5a   : > { %813 = vset.pattern.permute.xlu1 %v983_v3  ;;  %vm485_vm5 = vcmask 23552   ;;  %vm488_vm6 = vcmask 39936   ;;  %vm490_vm7 = vcmask 48128   ;;  %vm492_vm8 = vcmask 56320   ;;  %s715_s26 = sshll.u32 %s967_s18, 6  ;;  %s272_s7 = scalar_lea.vmem [#allocation7], %s704_s24 }
  0x5b   : > { %vm495_vm9 = vcmask 64512   ;;  %s589_s14 = sshll.u32 %s272_s7, 4  ;;  %vm572_vm10 = vcmask 60416   ;;  %s1213_s25 = scalar_lea.hbm %s1266_s4, %s715_s26  ;;  %s1215_s14 = int_to_ptr.vmem [resolvable:$true] %s589_s14 }
  0x5c   : > { %s575_s18 = scalar_lea.sflag [#allocation4], %s1173_s11  ;;  %s889_s22 = scalar_lea.vmem %s1215_s14, 64 }
  0x5d   : > { %p890_p0 = scmp.ne.s32.totalorder %s1215_s14, %s889_s22  ;;  %p1278_p5 = scmp.ne.s32.totalorder %s1271_s28, 0 }
  0x5e   : > { %s991_s24 = smov [#allocation7]  }
  0x5f   : > { %p891_p7 = pnand %p890_p0, %p1278_p5  ;;  %s893_s5 = sshll.u32 %s991_s24, 4  ;;  %s894_s5 = int_to_ptr.vmem [resolvable:$false] %s893_s5 }
  0x60   : > { %s895_s13 = scalar_lea.vmem %s894_s5, 128  ;;  %p896_p10 = scmp.lt.s32.totalorder %s1215_s14, %s894_s5 }
  0x61   : > { %p892_p13 = pneg %p891_p7  ;;  %p897_p12 = scmp.lt.s32.totalorder %s895_s13, %s889_s22 }
  0x63   : > { %p898_p1 = por %p897_p12, %p896_p10 }
  0x65   : > { %p899_p2 = pnand %p898_p1, %p892_p13 }
  0x82   : > { %812 = vset.pattern.permute.xlu0 %v984_v4 }
  0xd9   : > { %v290_v5 = vpop.trf.xlu0 }
  0xda   : > { %726 = vmatmul.mubr.msk.f32.vlgmr.msra.gmra.mrb[0].mxu0 %vm307_vm2, %v290_v5 }
 0x1ad   : > { %v381_v6 = vpop.f32.mrb[0].mxu0 }
 0x1ae   : > { %395 = vperm.xlu1 %813, %v381_v6   ;;  %388 = vperm.xlu0 %812, %v381_v6   ;;  %v727_v7 = vpop.f32.mrb[1].mxu0 }
 0x1b2   : > { %814 = vset.pattern.permute.xlu1 %v985_v8  ;;  %820 = vset.pattern.permute.xlu0 %v986_v9 }
 0x1b3   : > { %403 = vperm.xlu1 %814, %v381_v6  }
 0x1b7   : > { %815 = vset.pattern.permute.xlu1 %v987_v10 }
 0x1b8   : > { %438 = vperm.xlu1 %815, %v381_v6  }
 0x1bc   : > { %816 = vset.pattern.permute.xlu1 %v988_v11 }
 0x1bd   : > { %443 = vperm.xlu1 %816, %v381_v6  }
 0x1c1   : > { %817 = vset.pattern.permute.xlu1 %v989_v12 }
 0x1c2   : > { %411 = vperm.xlu1 %817, %v381_v6  }
 0x1c6   : > { %818 = vset.pattern.permute.xlu1 %v990_v13 }
 0x1c7   : > { %449 = vperm.xlu1 %818, %v381_v6  }
 0x1cb   : > { %819 = vset.pattern.permute.xlu1 %v986_v9 }
 0x1cc   : > { %455 = vperm.xlu1 %819, %v381_v6  }
 0x22d   : > { %v396_v14 = vpop.permute.xlu1 %395  ;;  %v389_v19 = vpop.permute.xlu0 %388 }
 0x22e   : > { %v398_v21 = vmul.f32 %v709_v17, %v396_v14  ;;  %v391_v22 = vmul.f32 %v389_v19, %v385_v18  ;;  %v494_v14 = vld [vmem:[%s1265_s3] sm:$0xf] }
 0x230   : > { %v399_v26 = vadd.f32 %v398_v21, %v391_v22 }
 0x232   : > { %v404_v15 = vpop.permute.xlu1 %403 }
 0x233   : > { %v406_v24 = vmul.f32 %v710_v20, %v404_v15 }
 0x235   : > { %v407_v28 = vadd.f32 %v406_v24, %v399_v26 }
 0x237   : > { %v439_v16 = vpop.permute.xlu1 %438 }
 0x238   : > { %v441_v33 = vmul.f32 %v439_v16, %v385_v18 }
 0x23c   : > { %v444_v23 = vpop.permute.xlu1 %443 }
 0x23d   : > { %v446_v31 = vmul.f32 %v709_v17, %v444_v23 }
 0x23f   : > { %v447_v35 = vadd.f32 %v446_v31, %v441_v33 }
 0x241   : > { %v412_v27 = vpop.permute.xlu1 %411 }
 0x242   : > { %v414_v29 = vmul.f32 %v711_v25, %v412_v27 }
 0x244   : > { %v415_v30 = vadd.f32 %v414_v29, %v407_v28 }
 0x246   : > { %v450_v32 = vpop.permute.xlu1 %449  ;;  %416 = vmax.xlane.f32.xlu1 %v415_v30 }
 0x247   : > { %v452_v34 = vmul.f32 %v710_v20, %v450_v32 }
 0x249   : > { %v453_v37 = vadd.f32 %v452_v34, %v447_v35 }
 0x24b   : > { %v456_v36 = vpop.permute.xlu1 %455 }
 0x24c   : > { %v458_v38 = vmul.f32 %v711_v25, %v456_v36 }
 0x24e   : > { %v459_v39 = vadd.f32 %v458_v38, %v453_v37 }
 0x250   : > { %460 = vmax.xlane.f32.xlu0 %v459_v39 }
 0x2d3   : > { %v417_v40 = vpop.xlane.xlu1 %416 }
 0x2d4   : > { %v418_v41 = vsub.f32 %v415_v30, %v417_v40 }
 0x2d6   : > { %v419_v42 = vmul.f32 1.442695, %v418_v41 }
 0x2d8   : > { %821 = vpow2.f32 %v419_v42 }
 0x2dd   : > { %v461_v43 = vpop.xlane.xlu0 %460 }
 0x2de   : > { %v462_v44 = vsub.f32 %v459_v39, %v461_v43 }
 0x2e0   : > { %v463_v45 = vmul.f32 1.442695, %v462_v44 }
 0x2e2   : > { %v822_v46 = vpop.eup %821  ;;  %823 = vpow2.f32 %v463_v45 }
 0x2e3   : > { %421 = vadd.xlane.f32.xlu1 %v822_v46 }
 0x2ec   : > { %v824_v47 = vpop.eup %823 }
 0x2ed   : > { %465 = vadd.xlane.f32.xlu1 %v824_v47 }
 0x370   : > { %v422_v48 = vpop.xlane.xlu1 %421 }
 0x371   : > { %825 = vrcp.f32 %v422_v48 }
 0x37a   : > { %v466_v49 = vpop.xlane.xlu1 %465 }
 0x37b   : > { %v826_v50 = vpop.eup %825  ;;  %827 = vrcp.f32 %v466_v49 }
 0x37c   : > { %v424_v51 = vmul.f32 %v826_v50, %v822_v46 }
 0x37e   : > { %v428_v52 = vmul.f32 %v709_v17, %v424_v51  ;;  %v425_v53 = vmul.f32 %v424_v51, %v385_v18  ;;  %v434_v54 = vmul.f32 %v711_v25, %v424_v51  ;;  %v431_v55 = vmul.f32 %v710_v20, %v424_v51 }
 0x380   : > { %429 = vadd.xlane.f32.xlu0 %v428_v52  ;;  %426 = vadd.xlane.f32.xlu1 %v425_v53 }
 0x384   : > { %435 = vadd.xlane.f32.xlu0 %v434_v54  ;;  %432 = vadd.xlane.f32.xlu1 %v431_v55 }
 0x385   : > { %v828_v56 = vpop.eup %827 }
 0x386   : > { %v468_v57 = vmul.f32 %v828_v56, %v824_v47 }
 0x388   : > { %v472_v58 = vmul.f32 %v709_v17, %v468_v57  ;;  %v469_v59 = vmul.f32 %v468_v57, %v385_v18  ;;  %v478_v60 = vmul.f32 %v711_v25, %v468_v57  ;;  %v475_v61 = vmul.f32 %v710_v20, %v468_v57 }
 0x38a   : > { %473 = vadd.xlane.f32.xlu0 %v472_v58  ;;  %470 = vadd.xlane.f32.xlu1 %v469_v59 }
 0x38e   : > { %479 = vadd.xlane.f32.xlu0 %v478_v60  ;;  %476 = vadd.xlane.f32.xlu1 %v475_v61 }
 0x40d   : > { %v427_v62 = vpop.xlane.xlu1 %426  ;;  %v430_v63 = vpop.xlane.xlu0 %429 }
 0x40e   : > { %v482_v2 = vsel %vm481_vm3, %v427_v62, %v430_v63 }
 0x411   : > { %v433_v0 = vpop.xlane.xlu1 %432  ;;  %v436_v3 = vpop.xlane.xlu0 %435 }
 0x412   : > { %v484_v4 = vsel %vm483_vm4, %v482_v2, %v433_v0 }
 0x413   : > { %v486_v5 = vsel %vm485_vm5, %v484_v4, %v436_v3 }
 0x417   : > { %v471_v6 = vpop.xlane.xlu1 %470  ;;  %v474_v7 = vpop.xlane.xlu0 %473 }
 0x418   : > { %v487_v8 = vsel %vm307_vm2, %v486_v5, %v471_v6 }
 0x419   : > { %v489_v9 = vsel %vm488_vm6, %v487_v8, %v474_v7 }
 0x41b   : > { %v477_v10 = vpop.xlane.xlu1 %476  ;;  %v480_v11 = vpop.xlane.xlu0 %479 }
 0x41c   : > { %v491_v12 = vsel %vm490_vm7, %v489_v9, %v477_v10 }
 0x41d   : > { %v493_v13 = vsel %vm492_vm8, %v491_v12, %v480_v11 }
 0x41e   : > { %729 = vmatpush3.xpose.msk.msra.mxu1 %vm495_vm9, %v493_v13 }
 0x421   : > { %731 = vmatmul.mubr.msk.f32.vlgmr.msra.gmra.mrb[0].mxu1 %vm495_vm9, %v494_v14 }
 0x4f4   : > { %v568_v15 = vpop.f32.mrb[0].mxu1 }
 0x4f5   : > { %v569_v16 = vadd.f32 %v568_v15, %v1191_v1  ;;  %v732_v17 = vpop.f32.mrb[1].mxu1 }
 0x4f7   : > { %573 = vst.msk [vmem:[%s272_s7] sm:$0xf] %vm572_vm10, %v569_v16 }
 0x4f8   : > { %902 = shalt.err (!%p899_p2)
}
 0x4f9   : > { %s903_s11 = scalar_lea.hbm %s1213_s25, 64  ;;  %s907_s8 = scalar_lea.hbm %s1266_s4, 128 }
 0x4fa   : > { %p904_p9 = scmp.ne.s32.totalorder %s1213_s25, %s903_s11  ;;  %p908_p6 = scmp.lt.u32.totalorder %s1213_s25, %s1266_s4 }
 0x4fb   : > { %p909_p4 = scmp.lt.u32.totalorder %s907_s8, %s903_s11  ;;  %p911_p0 = scmp.lt.u32.totalorder %s903_s11, %s1213_s25 }
 0x4fc   : > { %p905_p11 = pnand %p904_p9, %p1278_p5 }
 0x4fd   : > { %p910_p8 = por %p909_p4, %p908_p6 }
 0x4fe   : > { %p906_p3 = pneg %p905_p11 }
 0x4ff   : > { %p912_p7 = por %p911_p0, %p910_p8 }
 0x501   : > { %p913_p13 = pnand %p912_p7, %p906_p3 }
 0x503   : > { %916 = shalt.err (!%p913_p13)
}
 0x504   : > { %737 = dma.vmem_to_hbm [thread:$0]  (%p1278_p5), %s1215_s14, 64, %s1213_s25, %s575_s18  }
 0x505 PF: > { %s601_s26 = sand.u32 1, %s955_s15   ;;  %p1279_p10 = scmp.ne.s32.totalorder %s1272_s30, 0 }
 0x506   : > { %p1280_p12 = scmp.ge.s32.totalorder %s975_s20, 2  ;;  %s602_s7 = scalar_lea.sflag [#allocation4], %s601_s26 }
 0x508   : > { %p747_p1 = pnand %p1280_p12, %p1279_p10 }
 0x50a   : > { %950 = dma.done.wait (!%p747_p1), %s602_s7, 64  }
 0x50b   : > { %952 = vsyncadd (!%p747_p1), %s602_s7, 4294967232  ;;  %s23_s20 = sadd.s32 1, %s975_s20   ;;  %s1281_s15 = smov %s959_s16 }
 0x50c   : > { %p20_p2 = scmp.ge.s32.totalorder %s23_s20, 4   ;;  %s1282_s16 = smov %s963_s17 }
 0x50d   : > { %s1283_s17 = smov %s1073_s29  ;;  %s1284_s18 = smov %s971_s19 }
 0x50e   : > { %s1285_s19 = smov %s1287_s23  ;;  %22 = sbr.rel (!%p20_p2) target bundleno = 8 (0x8), region = 97 }
 0x515   :  { %607 = vsyncpa [#allocation3], 1 }
 0x516   :  { %609 = vsyncpa [#allocation3 + $0x1], 1 }
 0x517   :  { %610 = vsyncpa [#allocation6], 1 }
 0x518   :  { %612 = vsyncpa [#allocation6 + $0x1], 1 }
 0x519   :  { %613 = vsyncpa [#allocation4], 1 }
 0x51a   :  { %615 = vsyncpa [#allocation4 + $0x1], 1 }

</bundles_post_ra>
